<compile_context>
chip_gen: v7x
topology: tpu7x:2x2x1
jax: 0.10.0
libtpu: 0.0.40
codegen_flags: <defaults>
</compile_context>

<pallas_src>
import jax
import jax.numpy as jnp
from jax.experimental import pallas as pl
from jax.experimental.pallas import tpu as pltpu


# ----------------------------------------------------------------------------
# Kernel: one affine map.  bf16 MXU inputs, f32 accumulation, f32 output.
# ----------------------------------------------------------------------------
def affine_kernel(x_ref, w_ref, b_ref, out_ref):
    x_bf = x_ref[...].astype(jnp.bfloat16)          # cast in-kernel (no wrapper launch)
    acc = jnp.dot(x_bf, w_ref[...], preferred_element_type=jnp.float32)
    out_ref[...] = (acc + b_ref[...]).astype(out_ref.dtype)


# ----------------------------------------------------------------------------
# One-time parameter preparation: fold the whole Linear chain.
# Call ONCE after building/loading weights, never inside the per-call forward.
# ----------------------------------------------------------------------------
def prepare_params(layers):
    """Fold [(w, b), ...] (w: (in, out), b: (1, out)) into a single affine map."""
    w_eff, b_eff = layers[0]
    for w, b in layers[1:]:
        w_eff = w_eff @ w
        b_eff = b_eff @ w + b
    return {"w_eff": w_eff.astype(jnp.bfloat16),     # (d_in, d_out) MXU operand
            "b_eff": b_eff.astype(jnp.float32)}      # (1, d_out), added in f32


# ----------------------------------------------------------------------------
# Grid shape per TPU generation.
# ----------------------------------------------------------------------------
def _num_parallel_blocks():
    try:
        kind = jax.devices()[0].device_kind.lower()
    except Exception:
        return 1
    return 2 if "v7" in kind else 1   # v7x: 2 TensorCores/chip; v5e/v6e: 1 TC


def _pick_batch_tile(B):
    # v7x: split the 'parallel' batch axis into 2 blocks of >= 256 rows (one per
    # TensorCore).  v5e/v6e: a single block -- extra grid steps are pure
    # ~0.35us/step overhead for this latency-bound kernel and the whole working
    # set is far below VMEM capacity on every generation.
    if _num_parallel_blocks() == 2 and B % 2 == 0 and (B // 2) % 256 == 0:
        return B // 2
    return B


# ----------------------------------------------------------------------------
# Forward: exactly one pallas_call.
# ----------------------------------------------------------------------------
def nn_model_forward(x, prepped, *, batch_tile=None):
    """y = x @ W_eff + b_eff  ==  NNModel(deep_size=...).forward(x).

    x:       (B, input_size) float32
    prepped: output of prepare_params()
    """
    w_eff, b_eff = prepped["w_eff"], prepped["b_eff"]
    B, d_in = x.shape
    d_out = w_eff.shape[1]

    if batch_tile is None:
        batch_tile = _pick_batch_tile(B)
    assert B % batch_tile == 0, "batch must be a multiple of batch_tile"
    assert batch_tile == B or batch_tile % 8 == 0, "sub-batch tiles must be 8-row aligned"

    grid = (B // batch_tile,)
    return pl.pallas_call(
        affine_kernel,
        out_shape=jax.ShapeDtypeStruct((B, d_out), jnp.float32),
        grid_spec=pltpu.PrefetchScalarGridSpec(
            num_scalar_prefetch=0,
            grid=grid,
            in_specs=[
                # x tile: unpadded, full last dim (legal: equals the array dim).
                pl.BlockSpec((batch_tile, d_in), lambda i: (i, 0)),
                # Folded weight / bias: grid-invariant, tiny (<1 KiB each here).
                pl.BlockSpec((d_in, d_out), lambda i: (0, 0)),
                pl.BlockSpec((1, d_out), lambda i: (0, 0)),
            ],
            # Narrow output stored directly; no 128-lane padding, no post-slice.
            out_specs=pl.BlockSpec((batch_tile, d_out), lambda i: (i, 0)),
        ),
        compiler_params=pltpu.CompilerParams(dimension_semantics=("parallel",)),
    )(x, w_eff, b_eff)


# ----------------------------------------------------------------------------
# Deterministic parameter init (mirrors torch: orthogonal_ on dim>1 params;
# 1-D biases keep the nn.Linear default U(-1/sqrt(fan_in), 1/sqrt(fan_in))).
# Weights are stored pre-transposed as (in, out) so y = x @ W + b matches
# PyTorch's y = x @ W_torch.T + b.
# ----------------------------------------------------------------------------
def semi_orthogonal(key, d_in, d_out):
    big, small = max(d_in, d_out), min(d_in, d_out)
    a = jax.random.normal(key, (big, small), dtype=jnp.float32)
    q, r = jnp.linalg.qr(a)
    q = q * jnp.where(jnp.diagonal(r) >= 0, 1.0, -1.0)[None, :]
    return q if d_in >= d_out else q.T


_HIDDEN = {
    "small": [512, 256, 128],
    "medium": [512, 512, 512, 256, 128],
    "large": [1024, 1024, 512, 512, 512, 256, 256],
}


def make_params(key, input_size, output_size, deep_size="small"):
    dims = [input_size] + _HIDDEN[deep_size] + [output_size]
    n_layers = len(dims) - 1
    keys = jax.random.split(key, 2 * n_layers)
    layers = []
    for li in range(n_layers):
        d_in, d_out = dims[li], dims[li + 1]
        w = semi_orthogonal(keys[2 * li], d_in, d_out)
        bound = 1.0 / (d_in ** 0.5)
        b = jax.random.uniform(keys[2 * li + 1], (1, d_out),
                               minval=-bound, maxval=bound, dtype=jnp.float32)
        layers.append((w, b))
    return layers


def reference_forward(x, layers):
    h = x
    for w, b in layers:
        h = h @ w + b
    return h


if __name__ == "__main__":
    key = jax.random.PRNGKey(0)
    k_param, k_x = jax.random.split(key)

    batch = 512
    input_size = 32
    output_size = 8

    layers = make_params(k_param, input_size, output_size, deep_size="small")
    x = jax.random.normal(k_x, (batch, input_size), dtype=jnp.float32)

    ref = reference_forward(x, layers)

    # One-time fold + cast (hoisted out of the per-call forward).
    prepped = jax.tree_util.tree_map(jax.block_until_ready, prepare_params(layers))

    out = jax.block_until_ready(nn_model_forward(x, prepped))
    assert out.shape == (batch, output_size), out.shape
    max_err = jnp.max(jnp.abs(out - ref))
    assert jnp.allclose(out, ref, atol=2e-2, rtol=2e-2), (
        f"kernel mismatch: max |err| = {max_err}")

    print("KERNEL_OK")
</pallas_src>

<mosaic_0001>
module attributes {stable_mosaic.version = 11 : i64} {
  func.func @affine_kernel(%arg0: i32, %arg1: memref<512x32xf32, #tpu.memory_space<vmem>>, %arg2: memref<32x8xbf16, #tpu.memory_space<vmem>>, %arg3: memref<1x8xf32, #tpu.memory_space<vmem>>, %arg4: memref<512x8xf32, #tpu.memory_space<vmem>>) attributes {dimension_semantics = [#tpu.dimension_semantics<parallel>], iteration_bounds = array<i64: 1>, scalar_prefetch = 0 : i64, scratch_operands = 0 : i64, tpu.core_type = #tpu.core_type<tc>, window_params = [{transform_indices = @transform_0, window_bounds = array<i64: 512, 32>}, {pipeline_mode = #tpu.pipeline_mode<synchronous>, transform_indices = @transform_1, window_bounds = array<i64: 32, 8>}, {pipeline_mode = #tpu.pipeline_mode<synchronous>, transform_indices = @transform_2, window_bounds = array<i64: 1, 8>}, {transform_indices = @transform_3, window_bounds = array<i64: 512, 8>}]} {
    %c0 = arith.constant 0 : index
    %c0_0 = arith.constant 0 : index
    %0 = vector.load %arg1[%c0, %c0_0] : memref<512x32xf32, #tpu.memory_space<vmem>>, vector<512x32xf32>
    %1 = arith.truncf %0 : vector<512x32xf32> to vector<512x32xbf16>
    %c0_1 = arith.constant 0 : index
    %c0_2 = arith.constant 0 : index
    %2 = vector.load %arg2[%c0_1, %c0_2] : memref<32x8xbf16, #tpu.memory_space<vmem>>, vector<32x8xbf16>
    %cst = arith.constant dense<0.000000e+00> : vector<512x8xf32>
    %3 = tpu.matmul %1, %2, %cst {dimension_numbers = #tpu.dot_dimension_numbers<[1], [0], [0], [1], [0, 0, 1, 1], [], []>} : vector<512x32xbf16>, vector<32x8xbf16>, vector<512x8xf32> -> vector<512x8xf32>
    %c0_3 = arith.constant 0 : index
    %c0_4 = arith.constant 0 : index
    %4 = vector.load %arg3[%c0_3, %c0_4] : memref<1x8xf32, #tpu.memory_space<vmem>>, vector<1x8xf32>
    %5 = vector.broadcast %4 : vector<1x8xf32> to vector<512x8xf32>
    %6 = arith.addf %3, %5 : vector<512x8xf32>
    %c0_5 = arith.constant 0 : index
    %c0_6 = arith.constant 0 : index
    %7 = vector.load %arg4[%c0_5, %c0_6] : memref<512x8xf32, #tpu.memory_space<vmem>>, vector<512x8xf32>
    tpu.vector_store %arg4[%c0_5, %c0_6], %6 {strides = array<i32>} : memref<512x8xf32, #tpu.memory_space<vmem>>, vector<512x8xf32>,
    return
  }
  func.func @transform_0(%arg0: i32) -> (i32, i32) {
    %c0_i32 = arith.constant 0 : i32
    %c0_i32_0 = arith.constant 0 : i32
    return %arg0, %c0_i32 : i32, i32
  }
  func.func @transform_1(%arg0: i32) -> (i32, i32) {
    %c0_i32 = arith.constant 0 : i32
    %c0_i32_0 = arith.constant 0 : i32
    %c0_i32_1 = arith.constant 0 : i32
    return %c0_i32, %c0_i32_0 : i32, i32
  }
  func.func @transform_2(%arg0: i32) -> (i32, i32) {
    %c0_i32 = arith.constant 0 : i32
    %c0_i32_0 = arith.constant 0 : i32
    %c0_i32_1 = arith.constant 0 : i32
    return %c0_i32, %c0_i32_0 : i32, i32
  }
  func.func @transform_3(%arg0: i32) -> (i32, i32) {
    %c0_i32 = arith.constant 0 : i32
    %c0_i32_0 = arith.constant 0 : i32
    return %arg0, %c0_i32 : i32, i32
  }
}

</mosaic_0001>

<bundles_post_ra>
// kernel: tpu_custom_call.1
= control target key start
LH: loop header
LB: loop body
LE: loop exit
PB: predicated region body
PF: predicated region fallthrough
CT: control target
= control target key end

     0   :  { %vm134_vm0 = vcmask 261120   ;;  %vm520_vm1 = vcmask 64512   ;;  %s1307_s1 = inlined_call_operand.vmem [shape: bf16[32,8], index: 1, kind: input, shape index: {}]   ;;  %s1308_s0 = inlined_call_operand.vmem [shape: f32[512,32], index: 0, kind: input, shape index: {}]   ;;  %s1309_s2 = inlined_call_operand.vmem [shape: f32[1,8], index: 2, kind: input, shape index: {}]   ;;  %s1310_s3 = inlined_call_operand.vmem [shape: f32[512,8], index: 3, kind: output, shape index: {}]  }
   0x1   :  { %v730_v0 = vld [vmem:[%s1307_s1] sm:$0xff]   ;;  %v731_v1 = vld [vmem:[%s1307_s1 + $0x8] sm:$0xff]   ;;  %v17_v7 = vld [vmem:[%s1308_s0 + $0x10] sm:$0xff] }
   0x2   :  { %658 = vmatprep.subr.bf16.mxu0 %v730_v0  ;;  %726 = vmatprep.subr.bf16.mxu1 %v730_v0  ;;  %v15_v2 = vld [vmem:[%s1308_s0] sm:$0xff]  ;;  %v16_v3 = vld [vmem:[%s1308_s0 + $0x8] sm:$0xff]  ;;  %v18_v8 = vld [vmem:[%s1308_s0 + $0x18] sm:$0xff] }
   0x3   :  { %v47_v4 = vld [vmem:[%s1308_s0 + $0x100] sm:$0xff]  ;;  %659 = vmatpush3.bf16.msra.mxu0 %v730_v0  ;;  %728 = vmatpush3.bf16.msra.mxu1 %v730_v0  ;;  %v79_v5 = vpack.c.bf16 %v16_v3, %v15_v2  ;;  %v48_v6 = vld [vmem:[%s1308_s0 + $0x108] sm:$0xff]  ;;  %v49_v10 = vld [vmem:[%s1308_s0 + $0x110] sm:$0xff]  ;;  %v80_v16 = vpack.c.bf16 %v18_v8, %v17_v7 }
   0x4   :  { %660 = vmatprep.subr.bf16.mxu0 %v731_v1  ;;  %727 = vmatprep.subr.bf16.mxu1 %v731_v1  ;;  %v95_v9 = vpack.c.bf16 %v48_v6, %v47_v4  ;;  %v50_v11 = vld [vmem:[%s1308_s0 + $0x118] sm:$0xff]  ;;  %v19_v12 = vld [vmem:[%s1308_s0 + $0x20] sm:$0xff]  ;;  %v20_v13 = vld [vmem:[%s1308_s0 + $0x28] sm:$0xff] }
   0x5   :  { %662 = vmatprep.mubr.msk.bf16.mxu0 %vm134_vm0, %v79_v5  ;;  %v51_v14 = vld [vmem:[%s1308_s0 + $0x120] sm:$0xff]  ;;  %v52_v15 = vld [vmem:[%s1308_s0 + $0x128] sm:$0xff]  ;;  %v96_v17 = vpack.c.bf16 %v50_v11, %v49_v10  ;;  %v81_v18 = vpack.c.bf16 %v20_v13, %v19_v12  ;;  %v21_v20 = vld [vmem:[%s1308_s0 + $0x30] sm:$0xff] }
   0x6   :  { %694 = vmatprep.mubr.msk.bf16.mxu1 %vm134_vm0, %v95_v9  ;;  %v97_v19 = vpack.c.bf16 %v52_v15, %v51_v14  ;;  %v22_v21 = vld [vmem:[%s1308_s0 + $0x38] sm:$0xff]  ;;  %v53_v22 = vld [vmem:[%s1308_s0 + $0x130] sm:$0xff]  ;;  %v23_v24 = vld [vmem:[%s1308_s0 + $0x40] sm:$0xff] }
   0x7   :  { %661 = vmatpush3.bf16.msra.mxu0 %v731_v1  ;;  %729 = vmatpush3.bf16.msra.mxu1 %v731_v1  ;;  %v54_v23 = vld [vmem:[%s1308_s0 + $0x138] sm:$0xff]  ;;  %v24_v25 = vld [vmem:[%s1308_s0 + $0x48] sm:$0xff]  ;;  %v55_v26 = vld [vmem:[%s1308_s0 + $0x140] sm:$0xff]  ;;  %v82_v28 = vpack.c.bf16 %v22_v21, %v21_v20 }
   0x8   :  { %v56_v27 = vld [vmem:[%s1308_s0 + $0x148] sm:$0xff]  ;;  %v98_v29 = vpack.c.bf16 %v54_v23, %v53_v22  ;;  %v83_v30 = vpack.c.bf16 %v24_v25, %v23_v24  ;;  %v25_v32 = vld [vmem:[%s1308_s0 + $0x50] sm:$0xff]  ;;  %v26_v33 = vld [vmem:[%s1308_s0 + $0x58] sm:$0xff] }
   0x9   :  { %v99_v31 = vpack.c.bf16 %v56_v27, %v55_v26  ;;  %v57_v34 = vld [vmem:[%s1308_s0 + $0x150] sm:$0xff]  ;;  %v58_v35 = vld [vmem:[%s1308_s0 + $0x158] sm:$0xff]  ;;  %v27_v36 = vld [vmem:[%s1308_s0 + $0x60] sm:$0xff]  ;;  %v84_v40 = vpack.c.bf16 %v26_v33, %v25_v32 }
   0xa   :  { %663 = vmatmul.mubr.msk.bf16.vlgmr.msra.gmra.mrb[0].mxu0 %vm134_vm0, %v80_v16  ;;  %695 = vmatmul.mubr.msk.bf16.vlgmr.msra.gmra.mrb[0].mxu1 %vm134_vm0, %v96_v17  ;;  %v28_v37 = vld [vmem:[%s1308_s0 + $0x68] sm:$0xff]  ;;  %v59_v38 = vld [vmem:[%s1308_s0 + $0x160] sm:$0xff]  ;;  %v100_v41 = vpack.c.bf16 %v58_v35, %v57_v34  ;;  %v29_v44 = vld [vmem:[%s1308_s0 + $0x70] sm:$0xff] }
   0xb   :  { %666 = vmatprep.mubr.msk.bf16.mxu0 %vm134_vm0, %v81_v18  ;;  %698 = vmatprep.mubr.msk.bf16.mxu1 %vm134_vm0, %v97_v19  ;;  %v60_v39 = vld [vmem:[%s1308_s0 + $0x168] sm:$0xff]  ;;  %v85_v42 = vpack.c.bf16 %v28_v37, %v27_v36  ;;  %v30_v45 = vld [vmem:[%s1308_s0 + $0x78] sm:$0xff]  ;;  %v61_v46 = vld [vmem:[%s1308_s0 + $0x170] sm:$0xff] }
   0xc   :  { %v101_v43 = vpack.c.bf16 %v60_v39, %v59_v38  ;;  %v62_v47 = vld [vmem:[%s1308_s0 + $0x178] sm:$0xff]  ;;  %v31_v48 = vld [vmem:[%s1308_s0 + $0x80] sm:$0xff]  ;;  %v32_v49 = vld [vmem:[%s1308_s0 + $0x88] sm:$0xff]  ;;  %v86_v52 = vpack.c.bf16 %v30_v45, %v29_v44 }
   0xd   :  { %v63_v50 = vld [vmem:[%s1308_s0 + $0x180] sm:$0xff]  ;;  %v64_v51 = vld [vmem:[%s1308_s0 + $0x188] sm:$0xff]  ;;  %v102_v53 = vpack.c.bf16 %v62_v47, %v61_v46  ;;  %v87_v54 = vpack.c.bf16 %v32_v49, %v31_v48  ;;  %v33_v56 = vld [vmem:[%s1308_s0 + $0x90] sm:$0xff] }
   0xe   :  { %v103_v55 = vpack.c.bf16 %v64_v51, %v63_v50  ;;  %v34_v57 = vld [vmem:[%s1308_s0 + $0x98] sm:$0xff]  ;;  %v65_v58 = vld [vmem:[%s1308_s0 + $0x190] sm:$0xff]  ;;  %v35_v60 = vld [vmem:[%s1308_s0 + $0xa0] sm:$0xff] }
   0xf   :  { %v66_v59 = vld [vmem:[%s1308_s0 + $0x198] sm:$0xff]  ;;  %v36_v61 = vld [vmem:[%s1308_s0 + $0xa8] sm:$0xff]  ;;  %v67_v62 = vld [vmem:[%s1308_s0 + $0x1a0] sm:$0xff]  ;;  %v88_v0 = vpack.c.bf16 %v34_v57, %v33_v56 }
  0x10   :  { %v68_v63 = vld [vmem:[%s1308_s0 + $0x1a8] sm:$0xff]  ;;  %v104_v1 = vpack.c.bf16 %v66_v59, %v65_v58  ;;  %v89_v2 = vpack.c.bf16 %v36_v61, %v35_v60  ;;  %v37_v4 = vld [vmem:[%s1308_s0 + $0xb0] sm:$0xff]  ;;  %v38_v5 = vld [vmem:[%s1308_s0 + $0xb8] sm:$0xff] }
  0x11   :  { %v105_v3 = vpack.c.bf16 %v68_v63, %v67_v62  ;;  %v69_v6 = vld [vmem:[%s1308_s0 + $0x1b0] sm:$0xff]  ;;  %v70_v7 = vld [vmem:[%s1308_s0 + $0x1b8] sm:$0xff]  ;;  %v39_v8 = vld [vmem:[%s1308_s0 + $0xc0] sm:$0xff]  ;;  %v90_v12 = vpack.c.bf16 %v38_v5, %v37_v4 }
  0x12   :  { %667 = vmatmul.mubr.msk.bf16.gmra.mrb[4].mxu0 %vm134_vm0, %v82_v28  ;;  %699 = vmatmul.mubr.msk.bf16.gmra.mrb[4].mxu1 %vm134_vm0, %v98_v29  ;;  %v40_v9 = vld [vmem:[%s1308_s0 + $0xc8] sm:$0xff]  ;;  %v71_v10 = vld [vmem:[%s1308_s0 + $0x1c0] sm:$0xff]  ;;  %v106_v13 = vpack.c.bf16 %v70_v7, %v69_v6  ;;  %v41_v16 = vld [vmem:[%s1308_s0 + $0xd0] sm:$0xff] }
  0x13   :  { %670 = vmatprep.mubr.msk.bf16.mxu0 %vm134_vm0, %v83_v30  ;;  %702 = vmatprep.mubr.msk.bf16.mxu1 %vm134_vm0, %v99_v31  ;;  %v72_v11 = vld [vmem:[%s1308_s0 + $0x1c8] sm:$0xff]  ;;  %v91_v14 = vpack.c.bf16 %v40_v9, %v39_v8  ;;  %v42_v17 = vld [vmem:[%s1308_s0 + $0xd8] sm:$0xff]  ;;  %v73_v18 = vld [vmem:[%s1308_s0 + $0x1d0] sm:$0xff] }
  0x14   :  { %v107_v15 = vpack.c.bf16 %v72_v11, %v71_v10  ;;  %v74_v19 = vld [vmem:[%s1308_s0 + $0x1d8] sm:$0xff]  ;;  %v43_v20 = vld [vmem:[%s1308_s0 + $0xe0] sm:$0xff]  ;;  %v44_v21 = vld [vmem:[%s1308_s0 + $0xe8] sm:$0xff]  ;;  %v92_v24 = vpack.c.bf16 %v42_v17, %v41_v16 }
  0x15   :  { %v75_v22 = vld [vmem:[%s1308_s0 + $0x1e0] sm:$0xff]  ;;  %v76_v23 = vld [vmem:[%s1308_s0 + $0x1e8] sm:$0xff]  ;;  %v108_v25 = vpack.c.bf16 %v74_v19, %v73_v18  ;;  %v93_v26 = vpack.c.bf16 %v44_v21, %v43_v20  ;;  %v45_v28 = vld [vmem:[%s1308_s0 + $0xf0] sm:$0xff] }
  0x16   :  { %v109_v27 = vpack.c.bf16 %v76_v23, %v75_v22  ;;  %v46_v29 = vld [vmem:[%s1308_s0 + $0xf8] sm:$0xff]  ;;  %v77_v30 = vld [vmem:[%s1308_s0 + $0x1f0] sm:$0xff]  ;;  %v985_v34 = vld [vmem:[%s1309_s2] ss:$0 sm:$0xff] }
  0x17   :  { %v78_v31 = vld [vmem:[%s1308_s0 + $0x1f8] sm:$0xff]  ;;  %v94_v32 = vpack.c.bf16 %v46_v29, %v45_v28 }
  0x18   :  { %v110_v33 = vpack.c.bf16 %v78_v31, %v77_v30 }
  0x1a   :  { %671 = vmatmul.mubr.msk.bf16.gmra.mrb[8].mxu0 %vm134_vm0, %v84_v40  ;;  %703 = vmatmul.mubr.msk.bf16.gmra.mrb[8].mxu1 %vm134_vm0, %v100_v41 }
  0x1b   :  { %674 = vmatprep.mubr.msk.bf16.mxu0 %vm134_vm0, %v85_v42  ;;  %706 = vmatprep.mubr.msk.bf16.mxu1 %vm134_vm0, %v101_v43 }
  0x22   :  { %675 = vmatmul.mubr.msk.bf16.gmra.mrb[12].mxu0 %vm134_vm0, %v86_v52  ;;  %707 = vmatmul.mubr.msk.bf16.gmra.mrb[12].mxu1 %vm134_vm0, %v102_v53 }
  0x23   :  { %678 = vmatprep.mubr.msk.bf16.mxu0 %vm134_vm0, %v87_v54  ;;  %710 = vmatprep.mubr.msk.bf16.mxu1 %vm134_vm0, %v103_v55 }
  0x2a   :  { %679 = vmatmul.mubr.msk.bf16.gmra.mrb[16].mxu0 %vm134_vm0, %v88_v0  ;;  %711 = vmatmul.mubr.msk.bf16.gmra.mrb[16].mxu1 %vm134_vm0, %v104_v1 }
  0x2b   :  { %682 = vmatprep.mubr.msk.bf16.mxu0 %vm134_vm0, %v89_v2  ;;  %714 = vmatprep.mubr.msk.bf16.mxu1 %vm134_vm0, %v105_v3 }
  0x32   :  { %683 = vmatmul.mubr.msk.bf16.gmra.mrb[20].mxu0 %vm134_vm0, %v90_v12  ;;  %715 = vmatmul.mubr.msk.bf16.gmra.mrb[20].mxu1 %vm134_vm0, %v106_v13 }
  0x33   :  { %686 = vmatprep.mubr.msk.bf16.mxu0 %vm134_vm0, %v91_v14  ;;  %718 = vmatprep.mubr.msk.bf16.mxu1 %vm134_vm0, %v107_v15 }
  0x3a   :  { %687 = vmatmul.mubr.msk.bf16.gmra.mrb[24].mxu0 %vm134_vm0, %v92_v24  ;;  %719 = vmatmul.mubr.msk.bf16.gmra.mrb[24].mxu1 %vm134_vm0, %v108_v25 }
  0x3b   :  { %690 = vmatprep.mubr.msk.bf16.mxu0 %vm134_vm0, %v93_v26  ;;  %722 = vmatprep.mubr.msk.bf16.mxu1 %vm134_vm0, %v109_v27 }
  0x42   :  { %691 = vmatmul.mubr.msk.bf16.gmra.mrb[28].mxu0 %vm134_vm0, %v94_v32  ;;  %723 = vmatmul.mubr.msk.bf16.gmra.mrb[28].mxu1 %vm134_vm0, %v110_v33 }
  0xdd   :  { %v664_v35 = vpop.f32.mrb[0].mxu0  ;;  %v696_v36 = vpop.f32.mrb[0].mxu1 }
  0xde   :  { %v274_v37 = vadd.f32 %v664_v35, %v985_v34  ;;  %v402_v38 = vadd.f32 %v696_v36, %v985_v34  ;;  %v265_v39 = vpop.f32.mrb[1].mxu0  ;;  %v393_v40 = vpop.f32.mrb[1].mxu1 }
  0xdf   :  { %v266_v41 = vadd.f32 %v985_v34, %v265_v39  ;;  %v394_v42 = vadd.f32 %v985_v34, %v393_v40  ;;  %v665_v43 = vpop.f32.mrb[2].mxu0  ;;  %v697_v44 = vpop.f32.mrb[2].mxu1 }
  0xe0   :  { %523 = vst.msk [vmem:[%s1310_s3 + $0x10] sm:$0xff] %vm520_vm1, %v274_v37  ;;  %555 = vst.msk [vmem:[%s1310_s3 + $0x110] sm:$0xff] %vm520_vm1, %v402_v38  ;;  %v277_v45 = vadd.f32 %v665_v43, %v985_v34  ;;  %v405_v46 = vadd.f32 %v697_v44, %v985_v34  ;;  %v268_v47 = vpop.f32.mrb[3].mxu0  ;;  %v396_v48 = vpop.f32.mrb[3].mxu1 }
  0xe1   :  { %521 = vst.msk [vmem:[%s1310_s3] sm:$0xff] %vm520_vm1, %v266_v41  ;;  %553 = vst.msk [vmem:[%s1310_s3 + $0x100] sm:$0xff] %vm520_vm1, %v394_v42  ;;  %v269_v49 = vadd.f32 %v985_v34, %v268_v47  ;;  %v397_v50 = vadd.f32 %v985_v34, %v396_v48 }
  0xe2   :  { %524 = vst.msk [vmem:[%s1310_s3 + $0x18] sm:$0xff] %vm520_vm1, %v277_v45  ;;  %556 = vst.msk [vmem:[%s1310_s3 + $0x118] sm:$0xff] %vm520_vm1, %v405_v46 }
  0xe3   :  { %522 = vst.msk [vmem:[%s1310_s3 + $0x8] sm:$0xff] %vm520_vm1, %v269_v49  ;;  %554 = vst.msk [vmem:[%s1310_s3 + $0x108] sm:$0xff] %vm520_vm1, %v397_v50 }
  0xe5   :  { %v668_v51 = vpop.f32.mrb[4].mxu0  ;;  %v700_v52 = vpop.f32.mrb[4].mxu1 }
  0xe6   :  { %v290_v53 = vadd.f32 %v668_v51, %v985_v34  ;;  %v418_v54 = vadd.f32 %v700_v52, %v985_v34  ;;  %v281_v55 = vpop.f32.mrb[5].mxu0  ;;  %v409_v56 = vpop.f32.mrb[5].mxu1 }
  0xe7   :  { %v282_v57 = vadd.f32 %v985_v34, %v281_v55  ;;  %v410_v58 = vadd.f32 %v985_v34, %v409_v56  ;;  %v669_v59 = vpop.f32.mrb[6].mxu0  ;;  %v701_v60 = vpop.f32.mrb[6].mxu1 }
  0xe8   :  { %527 = vst.msk [vmem:[%s1310_s3 + $0x30] sm:$0xff] %vm520_vm1, %v290_v53  ;;  %559 = vst.msk [vmem:[%s1310_s3 + $0x130] sm:$0xff] %vm520_vm1, %v418_v54  ;;  %v293_v61 = vadd.f32 %v669_v59, %v985_v34  ;;  %v421_v62 = vadd.f32 %v701_v60, %v985_v34  ;;  %v284_v63 = vpop.f32.mrb[7].mxu0  ;;  %v412_v0 = vpop.f32.mrb[7].mxu1 }
  0xe9   :  { %525 = vst.msk [vmem:[%s1310_s3 + $0x20] sm:$0xff] %vm520_vm1, %v282_v57  ;;  %557 = vst.msk [vmem:[%s1310_s3 + $0x120] sm:$0xff] %vm520_vm1, %v410_v58  ;;  %v285_v1 = vadd.f32 %v985_v34, %v284_v63  ;;  %v413_v2 = vadd.f32 %v985_v34, %v412_v0 }
  0xea   :  { %528 = vst.msk [vmem:[%s1310_s3 + $0x38] sm:$0xff] %vm520_vm1, %v293_v61  ;;  %560 = vst.msk [vmem:[%s1310_s3 + $0x138] sm:$0xff] %vm520_vm1, %v421_v62 }
  0xeb   :  { %526 = vst.msk [vmem:[%s1310_s3 + $0x28] sm:$0xff] %vm520_vm1, %v285_v1  ;;  %558 = vst.msk [vmem:[%s1310_s3 + $0x128] sm:$0xff] %vm520_vm1, %v413_v2 }
  0xed   :  { %v672_v3 = vpop.f32.mrb[8].mxu0  ;;  %v704_v4 = vpop.f32.mrb[8].mxu1 }
  0xee   :  { %v306_v5 = vadd.f32 %v672_v3, %v985_v34  ;;  %v434_v6 = vadd.f32 %v704_v4, %v985_v34  ;;  %v297_v7 = vpop.f32.mrb[9].mxu0  ;;  %v425_v8 = vpop.f32.mrb[9].mxu1 }
  0xef   :  { %v298_v9 = vadd.f32 %v985_v34, %v297_v7  ;;  %v426_v10 = vadd.f32 %v985_v34, %v425_v8  ;;  %v673_v11 = vpop.f32.mrb[10].mxu0  ;;  %v705_v12 = vpop.f32.mrb[10].mxu1 }
  0xf0   :  { %531 = vst.msk [vmem:[%s1310_s3 + $0x50] sm:$0xff] %vm520_vm1, %v306_v5  ;;  %563 = vst.msk [vmem:[%s1310_s3 + $0x150] sm:$0xff] %vm520_vm1, %v434_v6  ;;  %v309_v13 = vadd.f32 %v673_v11, %v985_v34  ;;  %v437_v14 = vadd.f32 %v705_v12, %v985_v34  ;;  %v300_v15 = vpop.f32.mrb[11].mxu0  ;;  %v428_v16 = vpop.f32.mrb[11].mxu1 }
  0xf1   :  { %529 = vst.msk [vmem:[%s1310_s3 + $0x40] sm:$0xff] %vm520_vm1, %v298_v9  ;;  %561 = vst.msk [vmem:[%s1310_s3 + $0x140] sm:$0xff] %vm520_vm1, %v426_v10  ;;  %v301_v17 = vadd.f32 %v985_v34, %v300_v15  ;;  %v429_v18 = vadd.f32 %v985_v34, %v428_v16 }
  0xf2   :  { %532 = vst.msk [vmem:[%s1310_s3 + $0x58] sm:$0xff] %vm520_vm1, %v309_v13  ;;  %564 = vst.msk [vmem:[%s1310_s3 + $0x158] sm:$0xff] %vm520_vm1, %v437_v14 }
  0xf3   :  { %530 = vst.msk [vmem:[%s1310_s3 + $0x48] sm:$0xff] %vm520_vm1, %v301_v17  ;;  %562 = vst.msk [vmem:[%s1310_s3 + $0x148] sm:$0xff] %vm520_vm1, %v429_v18 }
  0xf5   :  { %v676_v19 = vpop.f32.mrb[12].mxu0  ;;  %v708_v20 = vpop.f32.mrb[12].mxu1 }
  0xf6   :  { %v322_v21 = vadd.f32 %v676_v19, %v985_v34  ;;  %v450_v22 = vadd.f32 %v708_v20, %v985_v34  ;;  %v313_v23 = vpop.f32.mrb[13].mxu0  ;;  %v441_v24 = vpop.f32.mrb[13].mxu1 }
  0xf7   :  { %v314_v25 = vadd.f32 %v985_v34, %v313_v23  ;;  %v442_v26 = vadd.f32 %v985_v34, %v441_v24  ;;  %v677_v27 = vpop.f32.mrb[14].mxu0  ;;  %v709_v28 = vpop.f32.mrb[14].mxu1 }
  0xf8   :  { %535 = vst.msk [vmem:[%s1310_s3 + $0x70] sm:$0xff] %vm520_vm1, %v322_v21  ;;  %567 = vst.msk [vmem:[%s1310_s3 + $0x170] sm:$0xff] %vm520_vm1, %v450_v22  ;;  %v325_v29 = vadd.f32 %v677_v27, %v985_v34  ;;  %v453_v30 = vadd.f32 %v709_v28, %v985_v34  ;;  %v316_v31 = vpop.f32.mrb[15].mxu0  ;;  %v444_v32 = vpop.f32.mrb[15].mxu1 }
  0xf9   :  { %533 = vst.msk [vmem:[%s1310_s3 + $0x60] sm:$0xff] %vm520_vm1, %v314_v25  ;;  %565 = vst.msk [vmem:[%s1310_s3 + $0x160] sm:$0xff] %vm520_vm1, %v442_v26  ;;  %v317_v33 = vadd.f32 %v985_v34, %v316_v31  ;;  %v445_v35 = vadd.f32 %v985_v34, %v444_v32 }
  0xfa   :  { %536 = vst.msk [vmem:[%s1310_s3 + $0x78] sm:$0xff] %vm520_vm1, %v325_v29  ;;  %568 = vst.msk [vmem:[%s1310_s3 + $0x178] sm:$0xff] %vm520_vm1, %v453_v30 }
  0xfb   :  { %534 = vst.msk [vmem:[%s1310_s3 + $0x68] sm:$0xff] %vm520_vm1, %v317_v33  ;;  %566 = vst.msk [vmem:[%s1310_s3 + $0x168] sm:$0xff] %vm520_vm1, %v445_v35 }
  0xfd   :  { %v680_v36 = vpop.f32.mrb[16].mxu0  ;;  %v712_v37 = vpop.f32.mrb[16].mxu1 }
  0xfe   :  { %v338_v38 = vadd.f32 %v680_v36, %v985_v34  ;;  %v466_v39 = vadd.f32 %v712_v37, %v985_v34  ;;  %v329_v40 = vpop.f32.mrb[17].mxu0  ;;  %v457_v41 = vpop.f32.mrb[17].mxu1 }
  0xff   :  { %v330_v42 = vadd.f32 %v985_v34, %v329_v40  ;;  %v458_v43 = vadd.f32 %v985_v34, %v457_v41  ;;  %v681_v44 = vpop.f32.mrb[18].mxu0  ;;  %v713_v45 = vpop.f32.mrb[18].mxu1 }
 0x100   :  { %539 = vst.msk [vmem:[%s1310_s3 + $0x90] sm:$0xff] %vm520_vm1, %v338_v38  ;;  %571 = vst.msk [vmem:[%s1310_s3 + $0x190] sm:$0xff] %vm520_vm1, %v466_v39  ;;  %v341_v46 = vadd.f32 %v681_v44, %v985_v34  ;;  %v469_v47 = vadd.f32 %v713_v45, %v985_v34  ;;  %v332_v48 = vpop.f32.mrb[19].mxu0  ;;  %v460_v49 = vpop.f32.mrb[19].mxu1 }
 0x101   :  { %537 = vst.msk [vmem:[%s1310_s3 + $0x80] sm:$0xff] %vm520_vm1, %v330_v42  ;;  %569 = vst.msk [vmem:[%s1310_s3 + $0x180] sm:$0xff] %vm520_vm1, %v458_v43  ;;  %v333_v50 = vadd.f32 %v985_v34, %v332_v48  ;;  %v461_v51 = vadd.f32 %v985_v34, %v460_v49 }
 0x102   :  { %540 = vst.msk [vmem:[%s1310_s3 + $0x98] sm:$0xff] %vm520_vm1, %v341_v46  ;;  %572 = vst.msk [vmem:[%s1310_s3 + $0x198] sm:$0xff] %vm520_vm1, %v469_v47 }
 0x103   :  { %538 = vst.msk [vmem:[%s1310_s3 + $0x88] sm:$0xff] %vm520_vm1, %v333_v50  ;;  %570 = vst.msk [vmem:[%s1310_s3 + $0x188] sm:$0xff] %vm520_vm1, %v461_v51 }
 0x105   :  { %v684_v52 = vpop.f32.mrb[20].mxu0  ;;  %v716_v53 = vpop.f32.mrb[20].mxu1 }
 0x106   :  { %v354_v54 = vadd.f32 %v684_v52, %v985_v34  ;;  %v482_v55 = vadd.f32 %v716_v53, %v985_v34  ;;  %v345_v56 = vpop.f32.mrb[21].mxu0  ;;  %v473_v57 = vpop.f32.mrb[21].mxu1 }
 0x107   :  { %v346_v58 = vadd.f32 %v985_v34, %v345_v56  ;;  %v474_v59 = vadd.f32 %v985_v34, %v473_v57  ;;  %v685_v60 = vpop.f32.mrb[22].mxu0  ;;  %v717_v61 = vpop.f32.mrb[22].mxu1 }
 0x108   :  { %543 = vst.msk [vmem:[%s1310_s3 + $0xb0] sm:$0xff] %vm520_vm1, %v354_v54  ;;  %575 = vst.msk [vmem:[%s1310_s3 + $0x1b0] sm:$0xff] %vm520_vm1, %v482_v55  ;;  %v357_v62 = vadd.f32 %v685_v60, %v985_v34  ;;  %v485_v63 = vadd.f32 %v717_v61, %v985_v34  ;;  %v348_v0 = vpop.f32.mrb[23].mxu0  ;;  %v476_v1 = vpop.f32.mrb[23].mxu1 }
 0x109   :  { %541 = vst.msk [vmem:[%s1310_s3 + $0xa0] sm:$0xff] %vm520_vm1, %v346_v58  ;;  %573 = vst.msk [vmem:[%s1310_s3 + $0x1a0] sm:$0xff] %vm520_vm1, %v474_v59  ;;  %v349_v2 = vadd.f32 %v985_v34, %v348_v0  ;;  %v477_v3 = vadd.f32 %v985_v34, %v476_v1 }
 0x10a   :  { %544 = vst.msk [vmem:[%s1310_s3 + $0xb8] sm:$0xff] %vm520_vm1, %v357_v62  ;;  %576 = vst.msk [vmem:[%s1310_s3 + $0x1b8] sm:$0xff] %vm520_vm1, %v485_v63 }
 0x10b   :  { %542 = vst.msk [vmem:[%s1310_s3 + $0xa8] sm:$0xff] %vm520_vm1, %v349_v2  ;;  %574 = vst.msk [vmem:[%s1310_s3 + $0x1a8] sm:$0xff] %vm520_vm1, %v477_v3 }
 0x10d   :  { %v688_v4 = vpop.f32.mrb[24].mxu0  ;;  %v720_v5 = vpop.f32.mrb[24].mxu1 }
 0x10e   :  { %v370_v6 = vadd.f32 %v688_v4, %v985_v34  ;;  %v498_v7 = vadd.f32 %v720_v5, %v985_v34  ;;  %v361_v8 = vpop.f32.mrb[25].mxu0  ;;  %v489_v9 = vpop.f32.mrb[25].mxu1 }
 0x10f   :  { %v362_v10 = vadd.f32 %v985_v34, %v361_v8  ;;  %v490_v11 = vadd.f32 %v985_v34, %v489_v9  ;;  %v689_v12 = vpop.f32.mrb[26].mxu0  ;;  %v721_v13 = vpop.f32.mrb[26].mxu1 }
 0x110   :  { %547 = vst.msk [vmem:[%s1310_s3 + $0xd0] sm:$0xff] %vm520_vm1, %v370_v6  ;;  %579 = vst.msk [vmem:[%s1310_s3 + $0x1d0] sm:$0xff] %vm520_vm1, %v498_v7  ;;  %v373_v14 = vadd.f32 %v689_v12, %v985_v34  ;;  %v501_v15 = vadd.f32 %v721_v13, %v985_v34  ;;  %v364_v16 = vpop.f32.mrb[27].mxu0  ;;  %v492_v17 = vpop.f32.mrb[27].mxu1 }
 0x111   :  { %545 = vst.msk [vmem:[%s1310_s3 + $0xc0] sm:$0xff] %vm520_vm1, %v362_v10  ;;  %577 = vst.msk [vmem:[%s1310_s3 + $0x1c0] sm:$0xff] %vm520_vm1, %v490_v11  ;;  %v365_v18 = vadd.f32 %v985_v34, %v364_v16  ;;  %v493_v19 = vadd.f32 %v985_v34, %v492_v17 }
 0x112   :  { %548 = vst.msk [vmem:[%s1310_s3 + $0xd8] sm:$0xff] %vm520_vm1, %v373_v14  ;;  %580 = vst.msk [vmem:[%s1310_s3 + $0x1d8] sm:$0xff] %vm520_vm1, %v501_v15 }
 0x113   :  { %546 = vst.msk [vmem:[%s1310_s3 + $0xc8] sm:$0xff] %vm520_vm1, %v365_v18  ;;  %578 = vst.msk [vmem:[%s1310_s3 + $0x1c8] sm:$0xff] %vm520_vm1, %v493_v19 }
 0x115   :  { %v692_v20 = vpop.f32.mrb[28].mxu0  ;;  %v724_v21 = vpop.f32.mrb[28].mxu1 }
 0x116   :  { %v386_v22 = vadd.f32 %v692_v20, %v985_v34  ;;  %v514_v23 = vadd.f32 %v724_v21, %v985_v34  ;;  %v377_v24 = vpop.f32.mrb[29].mxu0  ;;  %v505_v25 = vpop.f32.mrb[29].mxu1 }
 0x117   :  { %v378_v26 = vadd.f32 %v985_v34, %v377_v24  ;;  %v506_v27 = vadd.f32 %v985_v34, %v505_v25  ;;  %v693_v28 = vpop.f32.mrb[30].mxu0  ;;  %v725_v29 = vpop.f32.mrb[30].mxu1 }
 0x118   :  { %551 = vst.msk [vmem:[%s1310_s3 + $0xf0] sm:$0xff] %vm520_vm1, %v386_v22  ;;  %583 = vst.msk [vmem:[%s1310_s3 + $0x1f0] sm:$0xff] %vm520_vm1, %v514_v23  ;;  %v389_v30 = vadd.f32 %v693_v28, %v985_v34  ;;  %v517_v31 = vadd.f32 %v725_v29, %v985_v34  ;;  %v380_v32 = vpop.f32.mrb[31].mxu0  ;;  %v508_v33 = vpop.f32.mrb[31].mxu1 }
 0x119   :  { %549 = vst.msk [vmem:[%s1310_s3 + $0xe0] sm:$0xff] %vm520_vm1, %v378_v26  ;;  %581 = vst.msk [vmem:[%s1310_s3 + $0x1e0] sm:$0xff] %vm520_vm1, %v506_v27  ;;  %v381_v35 = vadd.f32 %v985_v34, %v380_v32  ;;  %v509_v36 = vadd.f32 %v985_v34, %v508_v33 }
 0x11a   :  { %552 = vst.msk [vmem:[%s1310_s3 + $0xf8] sm:$0xff] %vm520_vm1, %v389_v30  ;;  %584 = vst.msk [vmem:[%s1310_s3 + $0x1f8] sm:$0xff] %vm520_vm1, %v517_v31 }
 0x11b   :  { %550 = vst.msk [vmem:[%s1310_s3 + $0xe8] sm:$0xff] %vm520_vm1, %v381_v35  ;;  %582 = vst.msk [vmem:[%s1310_s3 + $0x1e8] sm:$0xff] %vm520_vm1, %v509_v36 }

</bundles_post_ra>
